<compile_context>
chip_gen: v5e
topology: v5e:2x2
jax: 0.10.0
libtpu: 0.0.40
codegen_flags: <defaults>
</compile_context>

<pallas_src>
import functools

import jax
import jax.numpy as jnp
from jax import lax
from jax.experimental import pallas as pl
from jax.experimental.pallas import tpu as pltpu


def _round_up(x, m):
    return ((x + m - 1) // m) * m


def _apply_activation(acc_f32, activation):
    """Fused epilogue activation in f32 (trace-time dispatch)."""
    if activation == "relu":
        return jnp.maximum(acc_f32, 0.0)
    if activation == "tanh":
        return jnp.tanh(acc_f32)
    if activation == "sigmoid":
        return jax.nn.sigmoid(acc_f32)
    if activation in (None, "identity", "linear"):
        return acc_f32
    raise ValueError(f"unsupported activation: {activation!r}")


# ----------------------------------------------------------------------------
# Fast path: weight fully resident in VMEM, grid over the batch axis only.
# ----------------------------------------------------------------------------
def _fused_kernel(x_ref, w_ref, b_ref, o_ref, *, activation):
    """o = activation(x @ W^T + b) for one batch tile; single MXU pass."""
    acc = lax.dot_general(
        x_ref[...],
        w_ref[...],                      # [N, K] PyTorch layout, contract on K
        dimension_numbers=(((1,), (1,)), ((), ())),
        preferred_element_type=jnp.float32,
    )
    acc = acc + b_ref[...].astype(jnp.float32)
    o_ref[...] = _apply_activation(acc, activation).astype(o_ref.dtype)


# ----------------------------------------------------------------------------
# Tiled path: (M, N, K) grid with a resident f32 accumulator over K.
# ----------------------------------------------------------------------------
def _tiled_kernel(x_ref, w_ref, b_ref, o_ref, acc_ref, *, activation):
    k = pl.program_id(2)

    @pl.when(k == 0)
    def _init():
        acc_ref[...] = jnp.zeros_like(acc_ref)

    acc_ref[...] += lax.dot_general(
        x_ref[...],
        w_ref[...],
        dimension_numbers=(((1,), (1,)), ((), ())),
        preferred_element_type=jnp.float32,
    )

    @pl.when(k == pl.num_programs(2) - 1)
    def _finalize():
        out = acc_ref[...] + b_ref[...].astype(jnp.float32)
        o_ref[...] = _apply_activation(out, activation).astype(o_ref.dtype)


def hidden_unit_forward(x, weight, bias, *, activation="relu",
                        tm=256, tn=256, tk=512,
                        compute_dtype=None, force_tiled=False):
    """activation(x @ weight.T + bias).

    x: [..., C_in], weight: [C_out, C_in] (PyTorch layout), bias: [C_out].
    """
    orig_shape = x.shape
    C_in = orig_shape[-1]
    x2d = x.reshape(-1, C_in)
    B = x2d.shape[0]
    C_out, c_in_w = weight.shape
    assert c_in_w == C_in and bias.shape == (C_out,)

    out_dtype = x.dtype
    if compute_dtype is not None:
        x2d = x2d.astype(compute_dtype)
        weight = weight.astype(compute_dtype)
    in_bytes = jnp.dtype(x2d.dtype).itemsize
    out_bytes = jnp.dtype(out_dtype).itemsize

    # Padded problem dims (lane dims -> multiples of 128, sublane -> 8).
    Np = _round_up(C_out, 128)
    Kp = _round_up(C_in, 128)

    # ---------------- fast path selection ----------------
    tm_fast = min(512, _round_up(B, 8))
    vmem_est = 2 * (tm_fast * Kp * in_bytes          # x tile (double-buffered)
                    + Np * Kp * in_bytes             # full weight
                    + Np * 4                         # bias row
                    + tm_fast * Np * out_bytes)      # out tile
    use_fused = (not force_tiled) and vmem_est <= 24 * 1024 * 1024

    flops = 2 * B * C_in * C_out
    bytes_accessed = (B * C_in * in_bytes + C_out * C_in * in_bytes
                      + C_out * 4 + B * C_out * out_bytes)
    cost = pl.CostEstimate(flops=flops, transcendentals=0,
                           bytes_accessed=bytes_accessed)

    if use_fused:
        Bp = _round_up(B, tm_fast)
        xp = x2d
        if (Bp, Kp) != (B, C_in):
            xp = jnp.pad(x2d, ((0, Bp - B), (0, Kp - C_in)))
        wp = weight
        if (Np, Kp) != (C_out, C_in):
            wp = jnp.pad(weight, ((0, Np - C_out), (0, Kp - C_in)))
        b2d = jnp.pad(bias, (0, Np - C_out)).reshape(1, Np)

        out = pl.pallas_call(
            functools.partial(_fused_kernel, activation=activation),
            out_shape=jax.ShapeDtypeStruct((Bp, Np), out_dtype),
            grid_spec=pltpu.PrefetchScalarGridSpec(
                num_scalar_prefetch=0,
                grid=(Bp // tm_fast,),
                in_specs=[
                    pl.BlockSpec((tm_fast, Kp), lambda i: (i, 0)),  # x tile
                    pl.BlockSpec((Np, Kp), lambda i: (0, 0)),       # full W
                    pl.BlockSpec((1, Np), lambda i: (0, 0)),        # bias row
                ],
                out_specs=pl.BlockSpec((tm_fast, Np), lambda i: (i, 0)),
            ),
            compiler_params=pltpu.CompilerParams(
                dimension_semantics=("parallel",),
                vmem_limit_bytes=48 * 1024 * 1024,
            ),
            cost_estimate=cost,
        )(xp, wp, b2d)
    else:
        # ---------------- tiled path ----------------
        tm_t = min(tm, _round_up(B, 8))
        tn_t = min(tn, Np)
        tk_t = min(tk, Kp)

        Bp = _round_up(B, tm_t)
        Npp = _round_up(C_out, tn_t)
        Kpp = _round_up(C_in, tk_t)

        xp = x2d
        if (Bp, Kpp) != (B, C_in):
            xp = jnp.pad(x2d, ((0, Bp - B), (0, Kpp - C_in)))
        wp = weight
        if (Npp, Kpp) != (C_out, C_in):
            wp = jnp.pad(weight, ((0, Npp - C_out), (0, Kpp - C_in)))
        b2d = jnp.pad(bias, (0, Npp - C_out)).reshape(1, Npp)

        grid = (Bp // tm_t, Npp // tn_t, Kpp // tk_t)
        Np = Npp  # for the final slice

        out = pl.pallas_call(
            functools.partial(_tiled_kernel, activation=activation),
            out_shape=jax.ShapeDtypeStruct((Bp, Npp), out_dtype),
            grid_spec=pltpu.PrefetchScalarGridSpec(
                num_scalar_prefetch=0,
                grid=grid,
                in_specs=[
                    pl.BlockSpec((tm_t, tk_t), lambda i, j, k: (i, k)),  # x
                    pl.BlockSpec((tn_t, tk_t), lambda i, j, k: (j, k)),  # W
                    pl.BlockSpec((1, tn_t), lambda i, j, k: (0, j)),     # bias
                ],
                out_specs=pl.BlockSpec((tm_t, tn_t), lambda i, j, k: (i, j)),
                scratch_shapes=[pltpu.VMEM((tm_t, tn_t), jnp.float32)],
            ),
            compiler_params=pltpu.CompilerParams(
                dimension_semantics=("parallel", "parallel", "arbitrary"),
                vmem_limit_bytes=48 * 1024 * 1024,
            ),
            cost_estimate=cost,
        )(xp, wp, b2d)

    out = out[:B, :C_out]
    return out.reshape(orig_shape[:-1] + (C_out,))


if __name__ == "__main__":
    key = jax.random.PRNGKey(0)
    k_x, k_w, k_b, k_x2, k_w2, k_b2 = jax.random.split(key, 6)

    # --- Small shapes consistent with the module (in=32 -> out=32) -----------
    B, C_in, C_out = 8, 32, 32
    x = jax.random.normal(k_x, (B, C_in), dtype=jnp.float32)
    bound = 1.0 / jnp.sqrt(jnp.float32(C_in))
    weight = jax.random.uniform(k_w, (C_out, C_in), minval=-bound, maxval=bound,
                                dtype=jnp.float32)
    bias = jax.random.uniform(k_b, (C_out,), minval=-bound, maxval=bound,
                              dtype=jnp.float32)

    out = hidden_unit_forward(x, weight, bias, activation="relu")
    jax.block_until_ready(out)
    ref = jnp.maximum(
        jnp.dot(x, weight.T, precision=lax.Precision.HIGHEST) + bias, 0.0)
    assert out.shape == (B, C_out)
    assert jnp.allclose(out, ref, atol=1e-5, rtol=1e-5)

    # tanh activation variant (the module takes activation as an argument).
    out_t = hidden_unit_forward(x, weight, bias, activation="tanh")
    jax.block_until_ready(out_t)
    ref_t = jnp.tanh(
        jnp.dot(x, weight.T, precision=lax.Precision.HIGHEST) + bias)
    assert jnp.allclose(out_t, ref_t, atol=1e-5, rtol=1e-5)

    # --- Larger shapes: exercise both the fused path and the tiled
    #     (M, N, K) accumulator path explicitly ------------------------------
    B2, C_in2, C_out2 = 256, 1024, 512
    x2 = jax.random.normal(k_x2, (B2, C_in2), dtype=jnp.float32)
    bound2 = 1.0 / jnp.sqrt(jnp.float32(C_in2))
    w2 = jax.random.uniform(k_w2, (C_out2, C_in2), minval=-bound2, maxval=bound2,
                            dtype=jnp.float32)
    b2 = jax.random.uniform(k_b2, (C_out2,), minval=-bound2, maxval=bound2,
                            dtype=jnp.float32)
    ref2 = jnp.maximum(
        jnp.dot(x2, w2.T, precision=lax.Precision.HIGHEST) + b2, 0.0)

    out2_fused = hidden_unit_forward(x2, w2, b2)                     # fast path
    out2_tiled = hidden_unit_forward(x2, w2, b2, force_tiled=True)   # tiled path
    jax.block_until_ready((out2_fused, out2_tiled))
    assert out2_fused.shape == (B2, C_out2)
    assert jnp.allclose(out2_fused, ref2, atol=1e-4, rtol=1e-4)
    assert jnp.allclose(out2_tiled, ref2, atol=1e-4, rtol=1e-4)

    print("KERNEL_OK")
</pallas_src>

<mosaic_0001>
module attributes {stable_mosaic.version = 11 : i64} {
  func.func @_fused_kernel(%arg0: i32, %arg1: memref<8x128xf32, #tpu.memory_space<vmem>>, %arg2: memref<128x128xf32, #tpu.memory_space<vmem>>, %arg3: memref<1x128xf32, #tpu.memory_space<vmem>>, %arg4: memref<8x128xf32, #tpu.memory_space<vmem>>) attributes {dimension_semantics = [#tpu.dimension_semantics<parallel>], iteration_bounds = array<i64: 1>, scalar_prefetch = 0 : i64, scratch_operands = 0 : i64, tpu.core_type = #tpu.core_type<tc>, window_params = [{transform_indices = @transform_0, window_bounds = array<i64: 8, 128>}, {pipeline_mode = #tpu.pipeline_mode<synchronous>, transform_indices = @transform_1, window_bounds = array<i64: 128, 128>}, {pipeline_mode = #tpu.pipeline_mode<synchronous>, transform_indices = @transform_2, window_bounds = array<i64: 1, 128>}, {transform_indices = @transform_3, window_bounds = array<i64: 8, 128>}]} {
    %c0 = arith.constant 0 : index
    %c0_0 = arith.constant 0 : index
    %0 = vector.load %arg1[%c0, %c0_0] : memref<8x128xf32, #tpu.memory_space<vmem>>, vector<8x128xf32>
    %c0_1 = arith.constant 0 : index
    %c0_2 = arith.constant 0 : index
    %1 = vector.load %arg2[%c0_1, %c0_2] : memref<128x128xf32, #tpu.memory_space<vmem>>, vector<128x128xf32>
    %cst = arith.constant dense<0.000000e+00> : vector<8x128xf32>
    %2 = tpu.matmul %0, %1, %cst {dimension_numbers = #tpu.dot_dimension_numbers<[1], [1], [0], [0], [0, 0, 1, 0], [], []>} : vector<8x128xf32>, vector<128x128xf32>, vector<8x128xf32> -> vector<8x128xf32>
    %c0_3 = arith.constant 0 : index
    %c0_4 = arith.constant 0 : index
    %3 = vector.load %arg3[%c0_3, %c0_4] : memref<1x128xf32, #tpu.memory_space<vmem>>, vector<1x128xf32>
    %4 = vector.broadcast %3 : vector<1x128xf32> to vector<8x128xf32>
    %5 = arith.addf %2, %4 : vector<8x128xf32>
    %cst_5 = arith.constant 0.000000e+00 : f32
    %6 = vector.broadcast %cst_5 : f32 to vector<8x128xf32>
    %7 = arith.maximumf %5, %6 : vector<8x128xf32>
    %c0_6 = arith.constant 0 : index
    %c0_7 = arith.constant 0 : index
    %8 = vector.load %arg4[%c0_6, %c0_7] : memref<8x128xf32, #tpu.memory_space<vmem>>, vector<8x128xf32>
    tpu.vector_store %arg4[%c0_6, %c0_7], %7 {strides = array<i32>} : memref<8x128xf32, #tpu.memory_space<vmem>>, vector<8x128xf32>,
    return
  }
  func.func @transform_0(%arg0: i32) -> (i32, i32) {
    %c0_i32 = arith.constant 0 : i32
    %c0_i32_0 = arith.constant 0 : i32
    return %arg0, %c0_i32 : i32, i32
  }
  func.func @transform_1(%arg0: i32) -> (i32, i32) {
    %c0_i32 = arith.constant 0 : i32
    %c0_i32_0 = arith.constant 0 : i32
    %c0_i32_1 = arith.constant 0 : i32
    return %c0_i32, %c0_i32_0 : i32, i32
  }
  func.func @transform_2(%arg0: i32) -> (i32, i32) {
    %c0_i32 = arith.constant 0 : i32
    %c0_i32_0 = arith.constant 0 : i32
    %c0_i32_1 = arith.constant 0 : i32
    return %c0_i32, %c0_i32_0 : i32, i32
  }
  func.func @transform_3(%arg0: i32) -> (i32, i32) {
    %c0_i32 = arith.constant 0 : i32
    %c0_i32_0 = arith.constant 0 : i32
    return %arg0, %c0_i32 : i32, i32
  }
}

</mosaic_0001>

<bundles_post_ra>
// kernel: tpu_custom_call.1
= control target key start
LH: loop header
LB: loop body
LE: loop exit
PB: predicated region body
PF: predicated region fallthrough
CT: control target
= control target key end

     0   :  { %8 = vsyncpa [#allocation3], 0  ;;  %s227_s0 = inlined_call_operand.hbm [shape: f32[8,128], index: 0, kind: input, shape index: {}]   ;;  %s228_s1 = inlined_call_operand.hbm [shape: f32[128,128], index: 1, kind: input, shape index: {}]   ;;  %s229_s2 = inlined_call_operand.vmem [shape: f32[1,128], index: 2, kind: input, shape index: {}]   ;;  %s230_s3 = inlined_call_operand.hbm [shape: f32[8,128], index: 3, kind: output, shape index: {}]  }
   0x1   :  { %9 = vsyncpa [#allocation6], 0 }
   0x2   :  { %10 = vsyncpa [#allocation4], 0  ;;  %s16_s14 = sshll.u32 %s227_s0, 4  ;;  %s190_s15 = smov [#allocation2]   ;;  %s17_s14 = int_to_ptr.hbm [resolvable:$true] %s16_s14 }
   0x3   :  { %s18_s16 = sshll.u32 %s190_s15, 4  ;;  %s26_s19 = sshll.u32 %s228_s1, 4  ;;  %s19_s16 = int_to_ptr.vmem [resolvable:$true] %s18_s16  ;;  %s27_s19 = int_to_ptr.hbm [resolvable:$true] %s26_s19 }
   0x4   :  { %21 = dma.hbm_to_vmem [thread:$0]  %s17_s14, 128, %s19_s16, [#allocation3]  }
   0x5   :  { %s191_s20 = smov [#allocation5]   ;;  %s192_s22 = smov 128  }
   0x6   :  { %s28_s21 = sshll.u32 %s191_s20, 4  ;;  %s193_s23 = smov 8   ;;  %s29_s21 = int_to_ptr.vmem [resolvable:$true] %s28_s21 }
   0x7   :  { %34 = dma.hbm_to_vmem [thread:$0]  %s27_s19, 2048, %s29_s21, [#allocation6], %s192_s22, %s192_s22, %s193_s23  }
   0x8   :  { %184 = dma.done.wait [#allocation3], 128  }
   0x9   :  { %185 = vsyncadd [#allocation3], 4294967168 }
   0xa   :  { %186 = dma.done.wait [#allocation6], 2048  }
   0xb   :  { %187 = vsyncadd [#allocation6], 4294965248  ;;  %v61_v0 = vld [vmem:[#allocation5 + $0x78] sm:$0xff]  ;;  %v60_v1 = vld [vmem:[#allocation5 + $0x70] sm:$0xff]  ;;  %s194_s24 = smov [#allocation7]   ;;  %s95_s28 = sshll.u32 %s230_s3, 4  ;;  %s96_s28 = int_to_ptr.hbm [resolvable:$true] %s95_s28 }
   0xc   :  { %66 = vmatpush.xpose.msra.mxu0 %v61_v0  ;;  %v59_v2 = vld [vmem:[#allocation5 + $0x68] sm:$0xff]  ;;  %v58_v3 = vld [vmem:[#allocation5 + $0x60] sm:$0xff]  ;;  %v57_v4 = vld [vmem:[#allocation5 + $0x58] sm:$0xff]  ;;  %s93_s25 = sshll.u32 %s194_s24, 4  ;;  %s94_s25 = int_to_ptr.vmem [resolvable:$true] %s93_s25 }
   0xd   :  { %v56_v5 = vld [vmem:[#allocation5 + $0x50] sm:$0xff]  ;;  %v55_v6 = vld [vmem:[#allocation5 + $0x48] sm:$0xff]  ;;  %v54_v7 = vld [vmem:[#allocation5 + $0x40] sm:$0xff] }
   0xe   :  { %v53_v8 = vld [vmem:[#allocation5 + $0x38] sm:$0xff]  ;;  %v52_v9 = vld [vmem:[#allocation5 + $0x30] sm:$0xff]  ;;  %v51_v10 = vld [vmem:[#allocation5 + $0x28] sm:$0xff] }
   0xf   :  { %v50_v11 = vld [vmem:[#allocation5 + $0x20] sm:$0xff]  ;;  %v49_v12 = vld [vmem:[#allocation5 + $0x18] sm:$0xff]  ;;  %v48_v13 = vld [vmem:[#allocation5 + $0x10] sm:$0xff] }
  0x10   :  { %67 = vmatpush.xpose.msra.mxu0 %v60_v1  ;;  %v47_v14 = vld [vmem:[#allocation5 + $0x8] sm:$0xff]  ;;  %v46_v15 = vld [vmem:[#allocation5] sm:$0xff]  ;;  %v45_v16 = vld [vmem:[#allocation2] sm:$0xff] }
  0x11   :  { %v111_v17 = vld [vmem:[%s229_s2] ss:$0 sm:$0xff] }
  0x14   :  { %68 = vmatpush.xpose.msra.mxu0 %v59_v2 }
  0x18   :  { %69 = vmatpush.xpose.msra.mxu0 %v58_v3 }
  0x1c   :  { %70 = vmatpush.xpose.msra.mxu0 %v57_v4 }
  0x20   :  { %71 = vmatpush.xpose.msra.mxu0 %v56_v5 }
  0x24   :  { %72 = vmatpush.xpose.msra.mxu0 %v55_v6 }
  0x28   :  { %73 = vmatpush.xpose.msra.mxu0 %v54_v7 }
  0x2c   :  { %74 = vmatpush.xpose.msra.mxu0 %v53_v8 }
  0x30   :  { %75 = vmatpush.xpose.msra.mxu0 %v52_v9 }
  0x34   :  { %76 = vmatpush.xpose.msra.mxu0 %v51_v10 }
  0x38   :  { %77 = vmatpush.xpose.msra.mxu0 %v50_v11 }
  0x3c   :  { %78 = vmatpush.xpose.msra.mxu0 %v49_v12 }
  0x40   :  { %79 = vmatpush.xpose.msra.mxu0 %v48_v13 }
  0x44   :  { %80 = vmatpush.xpose.msra.mxu0 %v47_v14 }
  0x48   :  { %81 = vmatpush.xpose.msra.mxu0 %v46_v15 }
  0x4b   :  { %82 = vmatmul.f32.vlgmr.msra.gmra.mxu0 %v45_v16 }
  0xc8   :  { %v83_v18 = vpop.f32.mrf.mxu0 }
  0xc9   :  { %v84_v19 = vadd.f32 %v111_v17, %v83_v18 }
  0xcb   :  { %v86_v20 = vmax.f32 %v84_v19, 0.0 }
  0xcd   :  { %87 = vst [vmem:[#allocation7] sm:$0xff] %v86_v20 }
  0xce   :  { %98 = dma.vmem_to_hbm [thread:$0]  %s94_s25, 128, %s96_s28, [#allocation4]  }
  0xcf   :  { %188 = dma.done.wait [#allocation4], 128  }
  0xd0   :  { %189 = vsyncadd [#allocation4], 4294967168 }
  0xd1   :  { %103 = vsyncpa [#allocation3], 1 }
  0xd2   :  { %104 = vsyncpa [#allocation6], 1 }
  0xd3   :  { %105 = vsyncpa [#allocation4], 1 }

</bundles_post_ra>
